<compile_context>
chip_gen: v5e
topology: v5e:2x2
jax: 0.10.0
libtpu: 0.0.40
codegen_flags: <defaults>
</compile_context>

<pallas_src>
import jax
import jax.numpy as jnp
from jax.experimental import pallas as pl
from jax.experimental.pallas import tpu as pltpu

_LANES = 1024            # lane-dense last dim (multiple of 128)
_MAX_BLOCK_ROWS = 2048   # 2048 x 1024 x 4 B = 8 MiB f32 per block


def _ste_kernel(x_ref, o_ref):
    # Pure VPU elementwise compare + cast; the kernel is HBM-bandwidth bound.
    o_ref[...] = (x_ref[...] > 0).astype(o_ref.dtype)


def _round_up(v: int, m: int) -> int:
    return -(-v // m) * m


def _sublane_multiple(dtype) -> int:
    # f32 -> 8, bf16/f16 -> 16, int8/fp8 -> 32 sublanes per packed tile.
    return {4: 8, 2: 16, 1: 32}.get(jnp.dtype(dtype).itemsize, 8)


def _choose_block_rows(rows: int, sub: int) -> int:
    """Pick the row-block size for a (rows, 1024) slab."""
    if rows <= sub:
        # Single block equal to the full row extent (allowed even if < sub).
        return rows
    # >= 2 grid steps so the "parallel" axis has work for both v7x TCs; make the
    # step count even when it is small so the two cores stay balanced.
    nblocks = max(2, -(-rows // _MAX_BLOCK_ROWS))
    if nblocks < 8 and nblocks % 2:
        nblocks += 1
    block_rows = _round_up(-(-rows // nblocks), sub)
    return max(sub, min(_MAX_BLOCK_ROWS, block_rows))


def _ste_main(x2: jax.Array, block_rows: int) -> jax.Array:
    rows = x2.shape[0]
    return pl.pallas_call(
        _ste_kernel,
        out_shape=jax.ShapeDtypeStruct((rows, _LANES), jnp.float32),
        grid_spec=pltpu.PrefetchScalarGridSpec(
            num_scalar_prefetch=0,
            grid=(pl.cdiv(rows, block_rows),),
            in_specs=[pl.BlockSpec((block_rows, _LANES), lambda i: (i, 0))],
            out_specs=pl.BlockSpec((block_rows, _LANES), lambda i: (i, 0)),
        ),
        compiler_params=pltpu.CompilerParams(
            dimension_semantics=("parallel",),
            vmem_limit_bytes=48 << 20,
        ),
    )(x2)


def ste_forward(x: jax.Array) -> jax.Array:
    """(x > 0).astype(float32), computed in a tiled, pipelined Pallas TPU kernel.

    The tensor is flattened (free for contiguous layouts); the largest prefix
    whose size is a multiple of 1024 is reshaped into a lane-dense (rows, 1024)
    slab and binarized on a 1D pipelined grid (partial row blocks are masked by
    Pallas).  A <1024-element ragged tail, if any, is handled with plain jnp and
    concatenated back.  Output dtype is float32 (matches torch .float()).
    """
    orig_shape = x.shape
    total = x.size

    if total == 0:
        return jnp.zeros(orig_shape, jnp.float32)

    xf = x.reshape(-1)
    rows = total // _LANES
    rem = total - rows * _LANES

    if rows == 0:
        # Sub-1024-element input: launch + per-step overhead dominates; fused
        # XLA elementwise is as fast or faster.
        return (x > 0).astype(jnp.float32)

    block_rows = _choose_block_rows(rows, _sublane_multiple(x.dtype))

    if rem == 0:
        # Common case: zero-copy reshape in, zero-copy reshape out.
        out = _ste_main(xf.reshape(rows, _LANES), block_rows)
        return out.reshape(orig_shape)

    # Ragged size: Pallas over the full-1024 rows, plain jnp on the tiny tail.
    main = rows * _LANES
    out_main = _ste_main(xf[:main].reshape(rows, _LANES), block_rows)
    tail = (xf[main:] > 0).astype(jnp.float32)
    return jnp.concatenate([out_main.reshape(-1), tail]).reshape(orig_shape)


if __name__ == "__main__":
    key = jax.random.PRNGKey(0)

    # NCHW input, small shape: batch=2, channels=4, spatial=16x16
    # (2048 elements -> exercises the Pallas main path, size % 1024 == 0).
    x = jax.random.normal(key, (2, 4, 16, 16), dtype=jnp.float32)
    y = ste_forward(x)
    jax.block_until_ready(y)

    y_ref = (x > 0).astype(jnp.float32)
    assert y.shape == x.shape
    assert y.dtype == jnp.float32
    assert bool(jnp.all(y == y_ref))

    # Ragged size (not a multiple of 1024): Pallas main slab + jnp tail.
    x2 = jax.random.normal(jax.random.PRNGKey(1), (3, 5, 7, 11), dtype=jnp.float32)
    y2 = ste_forward(x2)
    jax.block_until_ready(y2)
    assert bool(jnp.all(y2 == (x2 > 0).astype(jnp.float32)))

    # Medium ragged size: >=2 grid steps with a masked partial row block.
    x3 = jax.random.normal(jax.random.PRNGKey(2), (17, 1234), dtype=jnp.float32)
    y3 = ste_forward(x3)
    jax.block_until_ready(y3)
    assert bool(jnp.all(y3 == (x3 > 0).astype(jnp.float32)))

    # TODO(synk): backward (F.hardtanh on grad) is autograd-only and not part of
    # the forward kernel; add a custom_vjp if gradients through this op are needed.
    print("KERNEL_OK")
</pallas_src>

<mosaic_0001>
module attributes {stable_mosaic.version = 11 : i64} {
  func.func @_ste_kernel(%arg0: i32, %arg1: memref<2x1024xf32, #tpu.memory_space<vmem>>, %arg2: memref<2x1024xf32, #tpu.memory_space<vmem>>) attributes {dimension_semantics = [#tpu.dimension_semantics<parallel>], iteration_bounds = array<i64: 1>, scalar_prefetch = 0 : i64, scratch_operands = 0 : i64, tpu.core_type = #tpu.core_type<tc>, window_params = [{transform_indices = @transform_0, window_bounds = array<i64: 2, 1024>}, {transform_indices = @transform_1, window_bounds = array<i64: 2, 1024>}]} {
    %c0 = arith.constant 0 : index
    %c0_0 = arith.constant 0 : index
    %0 = vector.load %arg1[%c0, %c0_0] : memref<2x1024xf32, #tpu.memory_space<vmem>>, vector<2x1024xf32>
    %cst = arith.constant 0.000000e+00 : f32
    %1 = vector.broadcast %cst : f32 to vector<2x1024xf32>
    %2 = arith.cmpf ogt, %0, %1 : vector<2x1024xf32>
    %3 = arith.extui %2 : vector<2x1024xi1> to vector<2x1024xi32>
    %4 = arith.sitofp %3 : vector<2x1024xi32> to vector<2x1024xf32>
    %c0_1 = arith.constant 0 : index
    %c0_2 = arith.constant 0 : index
    %5 = vector.load %arg2[%c0_1, %c0_2] : memref<2x1024xf32, #tpu.memory_space<vmem>>, vector<2x1024xf32>
    tpu.vector_store %arg2[%c0_1, %c0_2], %4 {strides = array<i32>} : memref<2x1024xf32, #tpu.memory_space<vmem>>, vector<2x1024xf32>,
    return
  }
  func.func @transform_0(%arg0: i32) -> (i32, i32) {
    %c0_i32 = arith.constant 0 : i32
    %c0_i32_0 = arith.constant 0 : i32
    return %arg0, %c0_i32 : i32, i32
  }
  func.func @transform_1(%arg0: i32) -> (i32, i32) {
    %c0_i32 = arith.constant 0 : i32
    %c0_i32_0 = arith.constant 0 : i32
    return %arg0, %c0_i32 : i32, i32
  }
}

</mosaic_0001>

<bundles_post_ra>
// kernel: tpu_custom_call.1
= control target key start
LH: loop header
LB: loop body
LE: loop exit
PB: predicated region body
PF: predicated region fallthrough
CT: control target
= control target key end

     0   :  { %6 = vsyncpa [#allocation3], 0  ;;  %s126_s0 = inlined_call_operand.hbm [shape: f32[2,1024], index: 0, kind: input, shape index: {}]   ;;  %s127_s1 = inlined_call_operand.hbm [shape: f32[2,1024], index: 1, kind: output, shape index: {}]  }
   0x1   :  { %7 = vsyncpa [#allocation4], 0  ;;  %s13_s8 = sshll.u32 %s126_s0, 4  ;;  %s107_s9 = smov [#allocation2]   ;;  %s14_s8 = int_to_ptr.hbm [resolvable:$true] %s13_s8 }
   0x2   :  { %s15_s10 = sshll.u32 %s107_s9, 4  ;;  %s16_s10 = int_to_ptr.vmem [resolvable:$true] %s15_s10 }
   0x3   :  { %18 = dma.hbm_to_vmem [thread:$0]  %s14_s8, 256, %s16_s10, [#allocation3]  }
   0x4   :  { %103 = dma.done.wait [#allocation3], 256  }
   0x5   :  { %104 = vsyncadd [#allocation3], 4294967040  ;;  %s108_s11 = smov [#allocation5]   ;;  %s40_s15 = sshll.u32 %s127_s1, 4  ;;  %v23_v0 = vld [vmem:[#allocation2] sm:$0xff]  ;;  %v24_v1 = vld [vmem:[#allocation2 + $0x8] sm:$0xff]  ;;  %s41_s15 = int_to_ptr.hbm [resolvable:$true] %s40_s15 }
   0x6   :  { %s38_s12 = sshll.u32 %s108_s11, 4  ;;  %vm25_vm0 = vcmp.gt.f32.partialorder %v23_v0, 0.0  ;;  %vm26_vm1 = vcmp.gt.f32.partialorder %v24_v1, 0.0  ;;  %v109_v2 = vmov 0.0   ;;  %s39_s12 = int_to_ptr.vmem [resolvable:$true] %s38_s12 }
   0x7   :  { %v50_v3 = vsel %vm25_vm0, 1.0, %v109_v2  ;;  %v51_v4 = vsel %vm26_vm1, 1.0, %v109_v2 }
   0x8   :  { %31 = vst [vmem:[#allocation5] sm:$0xff] %v50_v3 }
   0x9   :  { %32 = vst [vmem:[#allocation5 + $0x8] sm:$0xff] %v51_v4 }
   0xa   :  { %43 = dma.vmem_to_hbm [thread:$0]  %s39_s12, 256, %s41_s15, [#allocation4]  }
   0xb   :  { %105 = dma.done.wait [#allocation4], 256  }
   0xc   :  { %106 = vsyncadd [#allocation4], 4294967040 }
   0xd   :  { %48 = vsyncpa [#allocation3], 1 }
   0xe   :  { %49 = vsyncpa [#allocation4], 1 }

</bundles_post_ra>
